<compile_context>
chip_gen: v7x
topology: tpu7x:2x2x1
jax: 0.10.0
libtpu: 0.0.40
codegen_flags: <defaults>
</compile_context>

<pallas_src>
import functools

import jax
import jax.numpy as jnp
from jax.experimental import pallas as pl
from jax.experimental.pallas import tpu as pltpu

_BN_EPS = 1e-5


def _round_up(x, m):
    return (x + m - 1) // m * m


def _cdiv(a, b):
    return -(-a // b)


@functools.lru_cache(maxsize=None)
def _roll_row_sign():
    """Probe pltpu.roll along the sublane (row) axis once per process.

    Returns +1 if pltpu.roll follows jnp.roll semantics (out[i] = in[i-shift]),
    -1 if the rotate direction is reversed, and 0 if the sublane roll is not
    available (the kernels then fall back to a slice+concat shift).
    """
    def _kern(x_ref, o_ref):
        o_ref[...] = pltpu.roll(x_ref[...], 1, 0)

    try:
        x = (jnp.arange(16, dtype=jnp.float32).reshape(16, 1)
             + jnp.zeros((16, 128), jnp.float32))
        y = pl.pallas_call(
            _kern, out_shape=jax.ShapeDtypeStruct((16, 128), jnp.float32))(x)
        if float(y[1, 0]) == 0.0 and float(y[0, 0]) == 15.0:
            return 1
        if float(y[0, 0]) == 1.0 and float(y[1, 0]) == 2.0:
            return -1
    except Exception:
        pass
    return 0


def _row_shift(a, offset, roll_sign):
    """b[i] = a[(i + offset) % R] along axis 0 (callers mask wrapped rows).

    Uses the XLU rotate (otherwise-idle slot) when available; falls back to a
    slice + concat shift with identical wrap semantics.
    """
    rows = a.shape[0]
    if roll_sign != 0:
        return pltpu.roll(a, (-offset * roll_sign) % rows, 0)
    if offset == -1:                                           # b[i] = a[i-1]
        return jnp.concatenate([a[rows - 1:, :], a[:rows - 1, :]], axis=0)
    return jnp.concatenate([a[1:, :], a[:1, :]], axis=0)       # b[i] = a[i+1]


def _tile_rows(m, reps):
    """Tile a (Lp, 1) mask to (reps*Lp, 1) with ~log2(reps) sublane concats."""
    if reps <= 1:
        return m
    half = _tile_rows(m, reps // 2)
    out = jnp.concatenate([half, half], axis=0)
    if reps % 2:
        out = jnp.concatenate([out, m], axis=0)
    return out


def _basic_block_kernel(x_ref, w1_ref, s1_ref, b1_ref, w2_ref, s2_ref, b2_ref,
                        *rest, nb, lp, lout, identity, unfolded, roll_sign):
    """Fused conv1(3,s)+bn1+relu -> conv2(3,1)+bn2 -> (+shortcut) -> relu.

    Per grid step (nb samples, rows flattened to R = nb*lp):
      x_ref   : (R, Cip) raw NLC input (stride==1) or (R, 3*Cip) unfolded taps
      w1_ref  : (3*Cip, Cp)  raw conv1 weight (tap-major), matmul dtype
      s1_ref, b1_ref : (1, Cp) f32  folded bn1 scale / bias
      w2_ref  : (3*Cp, Cp)   raw conv2 weight (tap-major)
      s2_ref, b2_ref : (1, Cp) f32  folded bn2 scale / bias
      [wsc_ref (Cip, Cp), ssc_ref, bsc_ref (1, Cp)]  only when not identity
      out_ref : (R, Cp) output (out dtype)
    """
    if identity:
        (out_ref,) = rest
    else:
        wsc_ref, ssc_ref, bsc_ref, out_ref = rest

    f32 = jnp.float32
    cp = w2_ref.shape[1]
    x = x_ref[...]
    cip = x.shape[1] // 3 if unfolded else x.shape[1]

    # Per-sample boundary masks built in-register (no mask DMA): they zero the
    # conv taps that would otherwise read the zero padding / a packed neighbor
    # sample after the +/-1 row shifts below.
    local = jax.lax.broadcasted_iota(jnp.int32, (lp, 1), 0)
    m_first = _tile_rows((local != 0).astype(f32), nb)            # (R, 1)
    m_last = _tile_rows((local != lout - 1).astype(f32), nb)      # (R, 1)

    def shift_prev(a):        # row i <- row i-1   (mask with m_first)
        return _row_shift(a, -1, roll_sign)

    def shift_next(a):        # row i <- row i+1   (mask with m_last)
        return _row_shift(a, +1, roll_sign)

    # ---- conv1 + bn1 + relu -------------------------------------------------
    if unfolded:
        # stride > 1: the 3 strided input taps were gathered on the host into
        # one row of width 3*Cip -> a single MXU matmul.
        z = jnp.dot(x, w1_ref[...], preferred_element_type=f32)
    else:
        # stride == 1: raw NLC input.  Three per-tap matmuls; the +/-1 taps are
        # realized by shifting the f32 MXU *outputs*, so no shifted / cast
        # input copies are ever materialized.
        z0 = jnp.dot(x, w1_ref[0 * cip:1 * cip, :], preferred_element_type=f32)
        z1 = jnp.dot(x, w1_ref[1 * cip:2 * cip, :], preferred_element_type=f32)
        z2 = jnp.dot(x, w1_ref[2 * cip:3 * cip, :], preferred_element_type=f32)
        z = shift_prev(z0) * m_first + z1 + shift_next(z2) * m_last
    y1 = jnp.maximum(z * s1_ref[...] + b1_ref[...], 0.0)          # (R, Cp) f32

    # ---- conv2 + bn2: one cast of y1, three accumulating per-tap matmuls,
    # shift the f32 outputs.  No (R, 3*Cp) operand, no scratch round-trip.
    y1m = y1.astype(w2_ref.dtype)
    u0 = jnp.dot(y1m, w2_ref[0 * cp:1 * cp, :], preferred_element_type=f32)
    u1 = jnp.dot(y1m, w2_ref[1 * cp:2 * cp, :], preferred_element_type=f32)
    u2 = jnp.dot(y1m, w2_ref[2 * cp:3 * cp, :], preferred_element_type=f32)
    c2 = shift_prev(u0) * m_first + u1 + shift_next(u2) * m_last
    y2 = c2 * s2_ref[...] + b2_ref[...]

    # ---- shortcut -------------------------------------------------------------
    if identity:
        sc = x.astype(f32)                     # stride==1, Cin==Cout: no matmul
    else:
        x_sc = x[:, cip:2 * cip] if unfolded else x   # middle tap == strided x
        sc = (jnp.dot(x_sc, wsc_ref[...], preferred_element_type=f32)
              * ssc_ref[...] + bsc_ref[...])

    out_ref[...] = jnp.maximum(y2 + sc, 0.0).astype(out_ref.dtype)


def _fold_bn(stats):
    gamma, beta, mean, var = stats
    scale = (gamma / jnp.sqrt(var + _BN_EPS)).astype(jnp.float32)
    bias = (beta - mean * scale).astype(jnp.float32)
    return scale, bias


def basic_block_forward(x, params, stride, *, matmul_dtype=jnp.bfloat16,
                        out_dtype=jnp.float32, x_layout="NCL",
                        out_layout="NCL"):
    """BasicBlock forward.

    x is (N, C_in, L) when x_layout == "NCL" (PyTorch Conv1d layout) or
    (N, L, C_in) when "NLC" (preferred when stacking blocks: skips the
    per-block NCL<->NLC transposes).  Returns the matching layout in
    `out_dtype` (use bf16 to halve the activation write-back of a stack).

    matmul_dtype feeds the MXU (bf16 recommended); accumulation and the whole
    BN/ReLU/residual epilogue are f32, and BatchNorm (eval mode) is applied as
    an f32 per-channel scale/bias so it never touches the bf16 weights.
    """
    if x_layout == "NCL":
        N, Cin, L = x.shape
        x_nlc = jnp.transpose(x, (0, 2, 1))
    elif x_layout == "NLC":
        N, L, Cin = x.shape
        x_nlc = x
    else:
        raise ValueError(f"bad x_layout {x_layout!r}")
    x_nlc = x_nlc.astype(jnp.float32)

    Cout = params["w1"].shape[0]
    Lout = (L - 1) // stride + 1                   # conv: k=3, pad=1, stride=s
    identity = (stride == 1) and (Cin == Cout)
    unfolded = stride > 1                          # host 3-tap unfold only when strided

    # Padded sizes: lane-dense channels, sublane-aligned rows.
    Cip = _round_up(Cin, 128)
    Cp = _round_up(Cout, 128)
    Lp = _round_up(Lout, 8)
    Kin = 3 * Cip if unfolded else Cip

    in_b = jnp.dtype(matmul_dtype).itemsize
    out_b = jnp.dtype(out_dtype).itemsize

    # ---- VMEM budgeting (generation aware) ----------------------------------
    # Per output row: double-buffered input + output blocks plus the live f32
    # intermediates inside the kernel (per-tap matmul outputs, y1 + its cast,
    # y2, shortcut, epilogue temps).
    row_bytes = 2 * Kin * in_b + 2 * Cp * out_b + 12 * Cp * 4
    per_sample = Lp * row_bytes
    wrows = 3 * Cip + 3 * Cp + (0 if identity else Cip)
    weight_bytes = 2 * (wrows * Cp * in_b + 6 * Cp * 4)
    try:
        vmem_cap = int(pltpu.get_tpu_info().vmem_capacity_bytes)
    except Exception:
        vmem_cap = 64 << 20                        # conservative: v7x per-TC VMEM
    vmem_limit = min(vmem_cap * 3 // 4, 110 << 20)
    budget = max(vmem_limit - weight_bytes - (4 << 20), per_sample)
    nb = max(1, min(budget // per_sample, _cdiv(1024, Lp), N))
    if N >= 2:
        nb = min(nb, _cdiv(N, 2))                  # keep >= 2 grid steps (dual-TC)
    nb = int(nb)
    Npad = _cdiv(N, nb) * nb
    R = nb * Lp                                    # rows per grid step
    vmem_limit = int(max(vmem_limit, weight_bytes + nb * per_sample + (4 << 20)))

    # ---- fold BN (eval mode) into per-channel f32 scale / bias --------------
    s1, b1 = _fold_bn(params["bn1"])
    s2, b2 = _fold_bn(params["bn2"])

    def pad_row(v):
        return jnp.pad(v, (0, Cp - Cout)).reshape(1, Cp).astype(jnp.float32)

    w1 = jnp.transpose(params["w1"], (2, 1, 0)).astype(jnp.float32)   # (3, Cin, Cout)
    w2 = jnp.transpose(params["w2"], (2, 1, 0)).astype(jnp.float32)   # (3, Cout, Cout)
    w1p = jnp.pad(w1, ((0, 0), (0, Cip - Cin), (0, Cp - Cout)))
    w1p = w1p.reshape(3 * Cip, Cp).astype(matmul_dtype)
    w2p = jnp.pad(w2, ((0, 0), (0, Cp - Cout), (0, Cp - Cout)))
    w2p = w2p.reshape(3 * Cp, Cp).astype(matmul_dtype)
    s1p, b1p, s2p, b2p = pad_row(s1), pad_row(b1), pad_row(s2), pad_row(b2)

    # ---- input glue ----------------------------------------------------------
    if unfolded:
        # stride > 1: gather the 3 strided conv1 taps on the host so the kernel
        # never touches discarded positions.
        xpad = jnp.pad(x_nlc, ((0, Npad - N), (1, 1), (0, Cip - Cin)))
        span = stride * (Lout - 1) + 1
        taps = [jax.lax.slice(xpad, (0, k, 0), (Npad, k + span, Cip),
                              (1, stride, 1)) for k in range(3)]
        x_blk = jnp.concatenate(taps, axis=-1)                # (Npad, Lout, 3*Cip)
        x_blk = jnp.pad(x_blk, ((0, 0), (0, Lp - Lout), (0, 0)))
    else:
        # stride == 1: ship the raw NLC activations (1/3 of the unfolded bytes).
        x_blk = jnp.pad(x_nlc, ((0, Npad - N), (0, Lp - L), (0, Cip - Cin)))
    x_blk = x_blk.reshape(Npad * Lp, Kin).astype(matmul_dtype)

    inputs = [x_blk, w1p, s1p, b1p, w2p, s2p, b2p]
    in_specs = [
        pl.BlockSpec((R, Kin), lambda n: (n, 0)),
        pl.BlockSpec((3 * Cip, Cp), lambda n: (0, 0)),
        pl.BlockSpec((1, Cp), lambda n: (0, 0)),
        pl.BlockSpec((1, Cp), lambda n: (0, 0)),
        pl.BlockSpec((3 * Cp, Cp), lambda n: (0, 0)),
        pl.BlockSpec((1, Cp), lambda n: (0, 0)),
        pl.BlockSpec((1, Cp), lambda n: (0, 0)),
    ]
    if not identity:
        ssc, bsc = _fold_bn(params["bns"])
        wsc = jnp.transpose(params["wsc"][:, :, 0], (1, 0)).astype(jnp.float32)
        wscp = jnp.pad(wsc, ((0, Cip - Cin), (0, Cp - Cout))).astype(matmul_dtype)
        inputs += [wscp, pad_row(ssc), pad_row(bsc)]
        in_specs += [pl.BlockSpec((Cip, Cp), lambda n: (0, 0)),
                     pl.BlockSpec((1, Cp), lambda n: (0, 0)),
                     pl.BlockSpec((1, Cp), lambda n: (0, 0))]

    kernel = functools.partial(
        _basic_block_kernel, nb=nb, lp=Lp, lout=Lout, identity=identity,
        unfolded=unfolded, roll_sign=_roll_row_sign())

    out = pl.pallas_call(
        kernel,
        out_shape=jax.ShapeDtypeStruct((Npad * Lp, Cp), out_dtype),
        grid_spec=pltpu.PrefetchScalarGridSpec(
            num_scalar_prefetch=0,
            grid=(Npad // nb,),
            in_specs=in_specs,
            out_specs=pl.BlockSpec((R, Cp), lambda n: (n, 0)),
        ),
        compiler_params=pltpu.CompilerParams(
            dimension_semantics=("parallel",),
            vmem_limit_bytes=vmem_limit,
        ),
    )(*inputs)

    out = out.reshape(Npad, Lp, Cp)[:N, :Lout, :Cout]
    if out_layout == "NCL":
        out = jnp.transpose(out, (0, 2, 1))
    elif out_layout != "NLC":
        raise ValueError(f"bad out_layout {out_layout!r}")
    return out


# ------------------- reference (pure JAX, PyTorch semantics) -------------------

def _ref_forward(x, p, stride, identity_shortcut):
    def conv(x, w, s, pad):
        return jax.lax.conv_general_dilated(
            x, w, window_strides=(s,), padding=[(pad, pad)],
            dimension_numbers=("NCH", "OIH", "NCH"))

    def bn(x, stats):
        g, b, m, v = stats
        return ((x - m[None, :, None]) / jnp.sqrt(v[None, :, None] + _BN_EPS)
                * g[None, :, None] + b[None, :, None])

    out = jax.nn.relu(bn(conv(x, p["w1"], stride, 1), p["bn1"]))
    out = bn(conv(out, p["w2"], 1, 1), p["bn2"])
    sc = x if identity_shortcut else bn(conv(x, p["wsc"], stride, 0), p["bns"])
    return jax.nn.relu(out + sc)


def _make_params(key, in_planes, planes, with_shortcut):
    ks = jax.random.split(key, 20)

    def bn_stats(k0, k1, k2, k3, c):
        gamma = jax.random.uniform(k0, (c,), jnp.float32, 0.5, 1.5)
        beta = 0.1 * jax.random.normal(k1, (c,), jnp.float32)
        mean = 0.1 * jax.random.normal(k2, (c,), jnp.float32)
        var = jax.random.uniform(k3, (c,), jnp.float32, 0.5, 1.5)
        return (gamma, beta, mean, var)

    p = {
        "w1": 0.2 * jax.random.normal(ks[0], (planes, in_planes, 3), jnp.float32),
        "w2": 0.2 * jax.random.normal(ks[1], (planes, planes, 3), jnp.float32),
        "bn1": bn_stats(ks[2], ks[3], ks[4], ks[5], planes),
        "bn2": bn_stats(ks[6], ks[7], ks[8], ks[9], planes),
    }
    if with_shortcut:
        p["wsc"] = 0.2 * jax.random.normal(ks[10], (planes, in_planes, 1), jnp.float32)
        p["bns"] = bn_stats(ks[11], ks[12], ks[13], ks[14], planes)
    return p


if __name__ == "__main__":
    key = jax.random.PRNGKey(0)
    keys = jax.random.split(key, 12)

    def check(x, p, stride, identity, tol, **kw):
        out = jax.block_until_ready(basic_block_forward(x, p, stride, **kw))
        ref = _ref_forward(x, p, stride, identity_shortcut=identity)
        assert out.shape == ref.shape, (out.shape, ref.shape)
        err = float(jnp.max(jnp.abs(out.astype(jnp.float32) - ref)))
        assert err < tol, (out.shape, err, tol)

    # 1) downsampling block: stride=2, Cin != Cout -> unfolded input + conv shortcut
    x1 = jax.random.normal(keys[0], (2, 4, 16), jnp.float32)
    p1 = _make_params(keys[1], 4, 8, with_shortcut=True)
    check(x1, p1, 2, False, 1e-4, matmul_dtype=jnp.float32)
    check(x1, p1, 2, False, 2e-1, matmul_dtype=jnp.bfloat16)

    # 2) identity block: stride=1, Cin == Cout -> raw NLC input, no shortcut matmul
    x2 = jax.random.normal(keys[2], (2, 8, 16), jnp.float32)
    p2 = _make_params(keys[3], 8, 8, with_shortcut=False)
    check(x2, p2, 1, True, 1e-4, matmul_dtype=jnp.float32)
    check(x2, p2, 1, True, 2e-1, matmul_dtype=jnp.bfloat16)
    # bf16 output writeback (halves activation HBM bytes between stacked blocks)
    check(x2, p2, 1, True, 2e-1, matmul_dtype=jnp.bfloat16, out_dtype=jnp.bfloat16)

    # 3) stride=1 but Cin != Cout -> raw input + 1x1 conv shortcut
    x3 = jax.random.normal(keys[4], (2, 4, 16), jnp.float32)
    p3 = _make_params(keys[5], 4, 8, with_shortcut=True)
    check(x3, p3, 1, False, 1e-4, matmul_dtype=jnp.float32)

    # 4) several samples packed per grid step + padded batch (N=5 -> nb=3, Npad=6)
    x4 = jax.random.normal(keys[6], (5, 8, 16), jnp.float32)
    p4 = _make_params(keys[7], 8, 8, with_shortcut=False)
    check(x4, p4, 1, True, 1e-4, matmul_dtype=jnp.float32)

    # 5) odd output length with stride=2 (Lout=5 padded to 8 rows)
    x5 = jax.random.normal(keys[8], (2, 4, 10), jnp.float32)
    p5 = _make_params(keys[9], 4, 8, with_shortcut=True)
    check(x5, p5, 2, False, 1e-4, matmul_dtype=jnp.float32)

    # 6) NLC in/out layout (avoids per-block transposes when stacking blocks)
    out_nlc = jax.block_until_ready(basic_block_forward(
        jnp.transpose(x2, (0, 2, 1)), p2, 1, matmul_dtype=jnp.float32,
        x_layout="NLC", out_layout="NLC"))
    ref_nlc = jnp.transpose(_ref_forward(x2, p2, 1, True), (0, 2, 1))
    assert float(jnp.max(jnp.abs(out_nlc - ref_nlc))) < 1e-4

    print("KERNEL_OK")
</pallas_src>

<mosaic_0001>
module attributes {stable_mosaic.version = 11 : i64} {
  func.func @_kern(%arg0: memref<16x128xf32, #tpu.memory_space<vmem>>, %arg1: memref<16x128xf32, #tpu.memory_space<vmem>>) attributes {dimension_semantics = [], scalar_prefetch = 0 : i64, scratch_operands = 0 : i64, tpu.core_type = #tpu.core_type<tc>} {
    %c0 = arith.constant 0 : index
    %c0_0 = arith.constant 0 : index
    %0 = vector.load %arg0[%c0, %c0_0] : memref<16x128xf32, #tpu.memory_space<vmem>>, vector<16x128xf32>
    %c1_i32 = arith.constant 1 : i32
    %1 = tpu.dynamic_rotate %0 by %c1_i32 dim 0 : vector<16x128xf32>, i32 -> vector<16x128xf32>
    %c0_1 = arith.constant 0 : index
    %c0_2 = arith.constant 0 : index
    %2 = vector.load %arg1[%c0_1, %c0_2] : memref<16x128xf32, #tpu.memory_space<vmem>>, vector<16x128xf32>
    tpu.vector_store %arg1[%c0_1, %c0_2], %1 {strides = array<i32>} : memref<16x128xf32, #tpu.memory_space<vmem>>, vector<16x128xf32>,
    return
  }
}

module attributes {stable_mosaic.version = 11 : i64} {
  func.func @_basic_block_kernel(%arg0: i32, %arg1: memref<8x384xf32, #tpu.memory_space<vmem>>, %arg2: memref<384x128xf32, #tpu.memory_space<vmem>>, %arg3: memref<1x128xf32, #tpu.memory_space<vmem>>, %arg4: memref<1x128xf32, #tpu.memory_space<vmem>>, %arg5: memref<384x128xf32, #tpu.memory_space<vmem>>, %arg6: memref<1x128xf32, #tpu.memory_space<vmem>>, %arg7: memref<1x128xf32, #tpu.memory_space<vmem>>, %arg8: memref<128x128xf32, #tpu.memory_space<vmem>>, %arg9: memref<1x128xf32, #tpu.memory_space<vmem>>, %arg10: memref<1x128xf32, #tpu.memory_space<vmem>>, %arg11: memref<8x128xf32, #tpu.memory_space<vmem>>) attributes {dimension_semantics = [#tpu.dimension_semantics<parallel>], iteration_bounds = array<i64: 2>, scalar_prefetch = 0 : i64, scratch_operands = 0 : i64, tpu.core_type = #tpu.core_type<tc>, window_params = [{transform_indices = @transform_0, window_bounds = array<i64: 8, 384>}, {pipeline_mode = #tpu.pipeline_mode<synchronous>, transform_indices = @transform_1, window_bounds = array<i64: 384, 128>}, {pipeline_mode = #tpu.pipeline_mode<synchronous>, transform_indices = @transform_2, window_bounds = array<i64: 1, 128>}, {pipeline_mode = #tpu.pipeline_mode<synchronous>, transform_indices = @transform_3, window_bounds = array<i64: 1, 128>}, {pipeline_mode = #tpu.pipeline_mode<synchronous>, transform_indices = @transform_4, window_bounds = array<i64: 384, 128>}, {pipeline_mode = #tpu.pipeline_mode<synchronous>, transform_indices = @transform_5, window_bounds = array<i64: 1, 128>}, {pipeline_mode = #tpu.pipeline_mode<synchronous>, transform_indices = @transform_6, window_bounds = array<i64: 1, 128>}, {pipeline_mode = #tpu.pipeline_mode<synchronous>, transform_indices = @transform_7, window_bounds = array<i64: 128, 128>}, {pipeline_mode = #tpu.pipeline_mode<synchronous>, transform_indices = @transform_8, window_bounds = array<i64: 1, 128>}, {pipeline_mode = #tpu.pipeline_mode<synchronous>, transform_indices = @transform_9, window_bounds = array<i64: 1, 128>}, {transform_indices = @transform_10, window_bounds = array<i64: 8, 128>}]} {
    %c0 = arith.constant 0 : index
    %c0_0 = arith.constant 0 : index
    %0 = vector.load %arg1[%c0, %c0_0] : memref<8x384xf32, #tpu.memory_space<vmem>>, vector<8x384xf32>
    %1 = tpu.iota {dimensions = array<i32: 0>} : vector<8x1xi32>
    %c0_i32 = arith.constant 0 : i32
    %2 = vector.broadcast %c0_i32 : i32 to vector<8x1xi32>
    %3 = arith.cmpi ne, %1, %2 : vector<8x1xi32>
    %4 = arith.extui %3 : vector<8x1xi1> to vector<8x1xi32>
    %5 = arith.sitofp %4 : vector<8x1xi32> to vector<8x1xf32>
    %c7_i32 = arith.constant 7 : i32
    %6 = vector.broadcast %c7_i32 : i32 to vector<8x1xi32>
    %7 = arith.cmpi ne, %1, %6 : vector<8x1xi32>
    %8 = arith.extui %7 : vector<8x1xi1> to vector<8x1xi32>
    %9 = arith.sitofp %8 : vector<8x1xi32> to vector<8x1xf32>
    %c0_1 = arith.constant 0 : index
    %c0_2 = arith.constant 0 : index
    %10 = vector.load %arg2[%c0_1, %c0_2] : memref<384x128xf32, #tpu.memory_space<vmem>>, vector<384x128xf32>
    %cst = arith.constant dense<0.000000e+00> : vector<8x128xf32>
    %11 = tpu.matmul %0, %10, %cst {dimension_numbers = #tpu.dot_dimension_numbers<[1], [0], [0], [1], [0, 0, 1, 1], [], []>} : vector<8x384xf32>, vector<384x128xf32>, vector<8x128xf32> -> vector<8x128xf32>
    %c0_3 = arith.constant 0 : index
    %c0_4 = arith.constant 0 : index
    %12 = vector.load %arg3[%c0_3, %c0_4] : memref<1x128xf32, #tpu.memory_space<vmem>>, vector<1x128xf32>
    %13 = vector.broadcast %12 : vector<1x128xf32> to vector<8x128xf32>
    %14 = arith.mulf %11, %13 : vector<8x128xf32>
    %c0_5 = arith.constant 0 : index
    %c0_6 = arith.constant 0 : index
    %15 = vector.load %arg4[%c0_5, %c0_6] : memref<1x128xf32, #tpu.memory_space<vmem>>, vector<1x128xf32>
    %16 = vector.broadcast %15 : vector<1x128xf32> to vector<8x128xf32>
    %17 = arith.addf %14, %16 : vector<8x128xf32>
    %cst_7 = arith.constant 0.000000e+00 : f32
    %18 = vector.broadcast %cst_7 : f32 to vector<8x128xf32>
    %19 = arith.maximumf %17, %18 : vector<8x128xf32>
    %c0_8 = arith.constant 0 : index
    %c0_9 = arith.constant 0 : index
    %20 = vector.load %arg5[%c0_8, %c0_9] : memref<384x128xf32, #tpu.memory_space<vmem>>, vector<128x128xf32>
    %cst_10 = arith.constant dense<0.000000e+00> : vector<8x128xf32>
    %21 = tpu.matmul %19, %20, %cst_10 {dimension_numbers = #tpu.dot_dimension_numbers<[1], [0], [0], [1], [0, 0, 1, 1], [], []>} : vector<8x128xf32>, vector<128x128xf32>, vector<8x128xf32> -> vector<8x128xf32>
    %c128 = arith.constant 128 : index
    %c0_11 = arith.constant 0 : index
    %22 = vector.load %arg5[%c128, %c0_11] : memref<384x128xf32, #tpu.memory_space<vmem>>, vector<128x128xf32>
    %cst_12 = arith.constant dense<0.000000e+00> : vector<8x128xf32>
    %23 = tpu.matmul %19, %22, %cst_12 {dimension_numbers = #tpu.dot_dimension_numbers<[1], [0], [0], [1], [0, 0, 1, 1], [], []>} : vector<8x128xf32>, vector<128x128xf32>, vector<8x128xf32> -> vector<8x128xf32>
    %c256 = arith.constant 256 : index
    %c0_13 = arith.constant 0 : index
    %24 = vector.load %arg5[%c256, %c0_13] : memref<384x128xf32, #tpu.memory_space<vmem>>, vector<128x128xf32>
    %cst_14 = arith.constant dense<0.000000e+00> : vector<8x128xf32>
    %25 = tpu.matmul %19, %24, %cst_14 {dimension_numbers = #tpu.dot_dimension_numbers<[1], [0], [0], [1], [0, 0, 1, 1], [], []>} : vector<8x128xf32>, vector<128x128xf32>, vector<8x128xf32> -> vector<8x128xf32>
    %26 = vector.extract_strided_slice %21 {offsets = [7, 0], sizes = [1, 128], strides = [1, 1]} : vector<8x128xf32> to vector<1x128xf32>
    %27 = vector.extract_strided_slice %21 {offsets = [0, 0], sizes = [7, 128], strides = [1, 1]} : vector<8x128xf32> to vector<7x128xf32>
    %28 = tpu.concatenate %26, %27 in 0 : vector<1x128xf32>, vector<7x128xf32> -> vector<8x128xf32>
    %29 = vector.broadcast %5 : vector<8x1xf32> to vector<8x128xf32>
    %30 = arith.mulf %28, %29 : vector<8x128xf32>
    %31 = arith.addf %30, %23 : vector<8x128xf32>
    %32 = vector.extract_strided_slice %25 {offsets = [1, 0], sizes = [7, 128], strides = [1, 1]} : vector<8x128xf32> to vector<7x128xf32>
    %33 = vector.extract_strided_slice %25 {offsets = [0, 0], sizes = [1, 128], strides = [1, 1]} : vector<8x128xf32> to vector<1x128xf32>
    %34 = tpu.concatenate %32, %33 in 0 : vector<7x128xf32>, vector<1x128xf32> -> vector<8x128xf32>
    %35 = vector.broadcast %9 : vector<8x1xf32> to vector<8x128xf32>
    %36 = arith.mulf %34, %35 : vector<8x128xf32>
    %37 = arith.addf %31, %36 : vector<8x128xf32>
    %c0_15 = arith.constant 0 : index
    %c0_16 = arith.constant 0 : index
    %38 = vector.load %arg6[%c0_15, %c0_16] : memref<1x128xf32, #tpu.memory_space<vmem>>, vector<1x128xf32>
    %39 = vector.broadcast %38 : vector<1x128xf32> to vector<8x128xf32>
    %40 = arith.mulf %37, %39 : vector<8x128xf32>
    %c0_17 = arith.constant 0 : index
    %c0_18 = arith.constant 0 : index
    %41 = vector.load %arg7[%c0_17, %c0_18] : memref<1x128xf32, #tpu.memory_space<vmem>>, vector<1x128xf32>
    %42 = vector.broadcast %41 : vector<1x128xf32> to vector<8x128xf32>
    %43 = arith.addf %40, %42 : vector<8x128xf32>
    %44 = vector.extract_strided_slice %0 {offsets = [0, 128], sizes = [8, 128], strides = [1, 1]} : vector<8x384xf32> to vector<8x128xf32>
    %c0_19 = arith.constant 0 : index
    %c0_20 = arith.constant 0 : index
    %45 = vector.load %arg8[%c0_19, %c0_20] : memref<128x128xf32, #tpu.memory_space<vmem>>, vector<128x128xf32>
    %cst_21 = arith.constant dense<0.000000e+00> : vector<8x128xf32>
    %46 = tpu.matmul %44, %45, %cst_21 {dimension_numbers = #tpu.dot_dimension_numbers<[1], [0], [0], [1], [0, 0, 1, 1], [], []>} : vector<8x128xf32>, vector<128x128xf32>, vector<8x128xf32> -> vector<8x128xf32>
    %c0_22 = arith.constant 0 : index
    %c0_23 = arith.constant 0 : index
    %47 = vector.load %arg9[%c0_22, %c0_23] : memref<1x128xf32, #tpu.memory_space<vmem>>, vector<1x128xf32>
    %48 = vector.broadcast %47 : vector<1x128xf32> to vector<8x128xf32>
    %49 = arith.mulf %46, %48 : vector<8x128xf32>
    %c0_24 = arith.constant 0 : index
    %c0_25 = arith.constant 0 : index
    %50 = vector.load %arg10[%c0_24, %c0_25] : memref<1x128xf32, #tpu.memory_space<vmem>>, vector<1x128xf32>
    %51 = vector.broadcast %50 : vector<1x128xf32> to vector<8x128xf32>
    %52 = arith.addf %49, %51 : vector<8x128xf32>
    %53 = arith.addf %43, %52 : vector<8x128xf32>
    %cst_26 = arith.constant 0.000000e+00 : f32
    %54 = vector.broadcast %cst_26 : f32 to vector<8x128xf32>
    %55 = arith.maximumf %53, %54 : vector<8x128xf32>
    %c0_27 = arith.constant 0 : index
    %c0_28 = arith.constant 0 : index
    %56 = vector.load %arg11[%c0_27, %c0_28] : memref<8x128xf32, #tpu.memory_space<vmem>>, vector<8x128xf32>
    tpu.vector_store %arg11[%c0_27, %c0_28], %55 {strides = array<i32>} : memref<8x128xf32, #tpu.memory_space<vmem>>, vector<8x128xf32>,
    return
  }
  func.func @transform_0(%arg0: i32) -> (i32, i32) {
    %c0_i32 = arith.constant 0 : i32
    %c0_i32_0 = arith.constant 0 : i32
    return %arg0, %c0_i32 : i32, i32
  }
  func.func @transform_1(%arg0: i32) -> (i32, i32) {
    %c0_i32 = arith.constant 0 : i32
    %c0_i32_0 = arith.constant 0 : i32
    %c0_i32_1 = arith.constant 0 : i32
    return %c0_i32, %c0_i32_0 : i32, i32
  }
  func.func @transform_2(%arg0: i32) -> (i32, i32) {
    %c0_i32 = arith.constant 0 : i32
    %c0_i32_0 = arith.constant 0 : i32
    %c0_i32_1 = arith.constant 0 : i32
    return %c0_i32, %c0_i32_0 : i32, i32
  }
  func.func @transform_3(%arg0: i32) -> (i32, i32) {
    %c0_i32 = arith.constant 0 : i32
    %c0_i32_0 = arith.constant 0 : i32
    %c0_i32_1 = arith.constant 0 : i32
    return %c0_i32, %c0_i32_0 : i32, i32
  }
  func.func @transform_4(%arg0: i32) -> (i32, i32) {
    %c0_i32 = arith.constant 0 : i32
    %c0_i32_0 = arith.constant 0 : i32
    %c0_i32_1 = arith.constant 0 : i32
    return %c0_i32, %c0_i32_0 : i32, i32
  }
  func.func @transform_5(%arg0: i32) -> (i32, i32) {
    %c0_i32 = arith.constant 0 : i32
    %c0_i32_0 = arith.constant 0 : i32
    %c0_i32_1 = arith.constant 0 : i32
    return %c0_i32, %c0_i32_0 : i32, i32
  }
  func.func @transform_6(%arg0: i32) -> (i32, i32) {
    %c0_i32 = arith.constant 0 : i32
    %c0_i32_0 = arith.constant 0 : i32
    %c0_i32_1 = arith.constant 0 : i32
    return %c0_i32, %c0_i32_0 : i32, i32
  }
  func.func @transform_7(%arg0: i32) -> (i32, i32) {
    %c0_i32 = arith.constant 0 : i32
    %c0_i32_0 = arith.constant 0 : i32
    %c0_i32_1 = arith.constant 0 : i32
    return %c0_i32, %c0_i32_0 : i32, i32
  }
  func.func @transform_8(%arg0: i32) -> (i32, i32) {
    %c0_i32 = arith.constant 0 : i32
    %c0_i32_0 = arith.constant 0 : i32
    %c0_i32_1 = arith.constant 0 : i32
    return %c0_i32, %c0_i32_0 : i32, i32
  }
  func.func @transform_9(%arg0: i32) -> (i32, i32) {
    %c0_i32 = arith.constant 0 : i32
    %c0_i32_0 = arith.constant 0 : i32
    %c0_i32_1 = arith.constant 0 : i32
    return %c0_i32, %c0_i32_0 : i32, i32
  }
  func.func @transform_10(%arg0: i32) -> (i32, i32) {
    %c0_i32 = arith.constant 0 : i32
    %c0_i32_0 = arith.constant 0 : i32
    return %arg0, %c0_i32 : i32, i32
  }
}

</mosaic_0001>

<bundles_post_ra>
// kernel: tpu_custom_call.1
= control target key start
LH: loop header
LB: loop body
LE: loop exit
PB: predicated region body
PF: predicated region fallthrough
CT: control target
= control target key end

     0   :  { %6 = vsyncpa [#allocation3], 0  ;;  %s147_s0 = inlined_call_operand.hbm [shape: f32[16,128], index: 0, kind: input, shape index: {}]   ;;  %s148_s1 = inlined_call_operand.hbm [shape: f32[16,128], index: 1, kind: output, shape index: {}]  }
   0x1   :  { %7 = vsyncpa [#allocation4], 0  ;;  %s103_s6 = smov [#allocation2]   ;;  %s55_s10 = scalar_lea.hbm %s147_s0, 256 }
   0x2   :  { %s13_s7 = sshll.u32 %s103_s6, 4  ;;  %p56_p0 = scmp.ne.s32.totalorder %s147_s0, %s55_s10  ;;  %s14_s7 = int_to_ptr.vmem [resolvable:$true] %s13_s7 }
   0x3   :  { %p59_p1 = scmp.lt.u32.totalorder %s55_s10, %s147_s0 }
   0x5   :  { %p61_p2 = pnand %p59_p1, %p56_p0 }
   0x7   :  { %64 = shalt.err (!%p61_p2)
}
   0x8   :  { %s65_s15 = scalar_lea.vmem %s14_s7, 256  ;;  %p70_p4 = scmp.lt.s32.totalorder %s14_s7, %s14_s7 }
   0x9   :  { %p66_p3 = scmp.ne.s32.totalorder %s14_s7, %s65_s15  ;;  %p71_p5 = scmp.lt.s32.totalorder %s65_s15, %s65_s15 }
   0xb   :  { %p72_p6 = por %p71_p5, %p70_p4 }
   0xd   :  { %p73_p7 = pnand %p72_p6, %p66_p3 }
   0xf   :  { %76 = shalt.err (!%p73_p7)
}
  0x10   :  { %s104_s16 = smov 128   ;;  %s105_s17 = smov 8  }
  0x11   :  { %19 = dma.hbm_to_vmem [thread:$0]  %s147_s0, 256, %s14_s7, [#allocation3], %s104_s16, %s104_s16, %s105_s17  }
  0x12   :  { %99 = dma.done.wait [#allocation3], 256  }
  0x13   :  { %100 = vsyncadd [#allocation3], 4294967040  ;;  %v27_v0 = vlaneseq  ;;  %s106_s20 = smov [#allocation5]   ;;  %v23_v2 = vld [vmem:[#allocation2] sm:$0xff]  ;;  %v24_v3 = vld [vmem:[#allocation2 + $0x8] sm:$0xff] }
  0x14   :  { %s39_s21 = sshll.u32 %s106_s20, 4  ;;  %v25_v4 = vrot.slane %v23_v2, 7  ;;  %v26_v5 = vrot.slane %v24_v3, 7  ;;  %s40_s21 = int_to_ptr.vmem [resolvable:$true] %s39_s21 }
  0x15   :  { %v28_v1 = vshrl.u32 %v27_v0, 7  ;;  %s77_s22 = scalar_lea.vmem %s40_s21, 256  ;;  %p82_p9 = scmp.lt.s32.totalorder %s40_s21, %s40_s21 }
  0x16   :  { %p78_p8 = scmp.ne.s32.totalorder %s40_s21, %s77_s22  ;;  %p83_p10 = scmp.lt.s32.totalorder %s77_s22, %s77_s22 }
  0x17   :  { %vm29_vm0 = vcmp.lt.s32.totalorder %v28_v1, 1 }
  0x18   :  { %v31_v6 = vsel %vm29_vm0, %v26_v5, %v25_v4  ;;  %v30_v7 = vsel %vm29_vm0, %v25_v4, %v26_v5  ;;  %p84_p11 = por %p83_p10, %p82_p9 }
  0x19   :  { %32 = vst [vmem:[#allocation5] sm:$0xff] %v31_v6  ;;  %33 = vst [vmem:[#allocation5 + $0x8] sm:$0xff] %v30_v7 }
  0x1a   :  { %p85_p12 = pnand %p84_p11, %p78_p8 }
  0x1c   :  { %88 = shalt.err (!%p85_p12)
}
  0x1d   :  { %s89_s24 = scalar_lea.hbm %s148_s1, 256 }
  0x1e   :  { %p90_p13 = scmp.ne.s32.totalorder %s148_s1, %s89_s24  ;;  %p93_p0 = scmp.lt.u32.totalorder %s89_s24, %s148_s1 }
  0x20   :  { %p95_p1 = pnand %p93_p0, %p90_p13 }
  0x22   :  { %98 = shalt.err (!%p95_p1)
}
  0x23   :  { %45 = dma.vmem_to_hbm [thread:$0]  %s40_s21, 256, %s148_s1, [#allocation4], %s104_s16, %s104_s16, %s105_s17  }
  0x24   :  { %101 = dma.done.wait [#allocation4], 256  }
  0x25   :  { %102 = vsyncadd [#allocation4], 4294967040 }
  0x26   :  { %49 = vsyncpa [#allocation3], 1 }
  0x27   :  { %50 = vsyncpa [#allocation4], 1 }

// kernel: tpu_custom_call.1
= control target key start
LH: loop header
LB: loop body
LE: loop exit
PB: predicated region body
PF: predicated region fallthrough
CT: control target
= control target key end

     0   :  { %s2301_s0 = inlined_call_operand.hbm [shape: f32[16,384], index: 0, kind: input, shape index: {}]   ;;  %s2302_s1 = inlined_call_operand.hbm [shape: f32[384,128], index: 1, kind: input, shape index: {}]   ;;  %s2303_s2 = inlined_call_operand.vmem [shape: f32[1,128], index: 2, kind: input, shape index: {}]   ;;  %s2304_s3 = inlined_call_operand.vmem [shape: f32[1,128], index: 3, kind: input, shape index: {}]   ;;  %s2305_s4 = inlined_call_operand.hbm [shape: f32[384,128], index: 4, kind: input, shape index: {}]   ;;  %s2306_s5 = inlined_call_operand.vmem [shape: f32[1,128], index: 5, kind: input, shape index: {}]   ;;  %s2307_s6 = inlined_call_operand.vmem [shape: f32[1,128], index: 6, kind: input, shape index: {}]   ;;  %s2308_s7 = inlined_call_operand.hbm [shape: f32[128,128], index: 7, kind: input, shape index: {}]   ;;  %s2309_s8 = inlined_call_operand.vmem [shape: f32[1,128], index: 8, kind: input, shape index: {}]   ;;  %s2310_s9 = inlined_call_operand.vmem [shape: f32[1,128], index: 9, kind: input, shape index: {}]   ;;  %s2311_s10 = inlined_call_operand.hbm [shape: f32[16,128], index: 10, kind: output, shape index: {}]  }
   0x1   :  { %2318 = sst [smem:[#allocation17_spill]] %s2307_s6 }
   0x2   :  { %2319 = sst [smem:[#allocation18_spill]] %s2311_s10 }
   0x3   :  { %15 = vsyncpa [#allocation3], 0 }
   0x4   :  { %17 = vsyncpa [#allocation3 + $0x1], 0 }
   0x5   :  { %18 = vsyncpa [#allocation6], 0 }
   0x6   :  { %19 = vsyncpa [#allocation9], 0 }
   0x7   :  { %20 = vsyncpa [#allocation4], 0 }
   0x8   :  { %22 = vsyncpa [#allocation4 + $0x1], 0  ;;  %s1953_s13 = smov 0   ;;  %s1955_s14 = smov 0  }
   0x9   :  { %s1957_s15 = smov 0   ;;  %s1959_s16 = smov 0  }
   0xa LB: > { %2320 = sst [smem:[#allocation15_spill]] %s1874_s13  ;;  %s1974_s17 = sadd.s32 4294967295, %s1886_s16   ;;  %s1886_s16 = sphi %s1959_s16, %s2346_s16   ;;  %s1882_s15 = sphi %s1957_s15, %s2345_s15   ;;  %s1878_s14 = sphi %s1955_s14, %s2344_s14   ;;  %s1874_s13 = sphi %s1953_s13, %s2343_s13  }
   0xb   : > { %s1142_s18 = sadd.s32 4294967294, %s1886_s16   ;;  %p48_p0 = scmp.ne.s32.totalorder %s1878_s14, %s1874_s13 }
   0xc   : > { %p2312_p1 = scmp.eq.s32.totalorder %s1974_s17, 0  ;;  %p267_p3 = scmp.eq.s32.totalorder %s1142_s18, 1 }
   0xd   : > { %p1143_p5 = scmp.ge.s32.totalorder %s1886_s16, 1  ;;  %p274_p7 = scmp.lt.s32.totalorder %s1886_s16, 3 }
   0xe   : > { %p1983_p4 = por %p2312_p1, %p48_p0  ;;  %p1988_p6 = por %p267_p3, %p48_p0 }
   0xf   : > { %p1993_p8 = pnand %p1143_p5, %p274_p7  ;;  %s1888_s22 = smov [#allocation5]  }
  0x10   : > { %s2321_s19 = scalar_select %p1983_p4, 1, 0 }
  0x11   : > { %s2322_s20 = scalar_select %p1988_p6, 1, 0 }
  0x12   : > { %s2324_s21 = scalar_select %p1993_p8, 1, 0 }
  0x13   : > { %2323 = sst [smem:[#allocation16_spill]] %s2322_s20  ;;  %s286_s23 = sshll.u32 %s1888_s22, 4  ;;  %s1997_s23 = int_to_ptr.vmem [resolvable:$true] %s286_s23 }
  0x14   : > { %p1632_p9 = pneg %p1993_p8  ;;  %s1889_s25 = smov [#allocation7]  }
  0x15   : > { %s305_s26 = sshll.u32 %s1889_s25, 4  ;;  %s1890_s27 = smov [#allocation8]   ;;  %s2008_s26 = int_to_ptr.vmem [resolvable:$true] %s305_s26 }
  0x16   : > { %p2004_p11 = pnand %p1632_p9, %p2312_p1  ;;  %s2010_s28 = sshll.u32 %s1890_s27, 4  ;;  %s325_s28 = int_to_ptr.vmem [resolvable:$true] %s2010_s28 }
  0x17   : > { %s1698_s11 = scalar_lea.hbm %s2302_s1, 6144 }
  0x18   : > { %p1699_p12 = scmp.ne.s32.totalorder %s2302_s1, %s1698_s11  ;;  %p2020_p13 = pneg %p2004_p11 }
  0x19   : > { %p1705_p5 = scmp.lt.u32.totalorder %s1698_s11, %s2302_s1 }
  0x1a   : > { %p1701_p0 = pnand %p2020_p13, %p1699_p12 }
  0x1c   : > { %p1702_p3 = pneg %p1701_p0 }
  0x1e   : > { %p1707_p7 = pnand %p1705_p5, %p1702_p3 }
  0x20   : > { %1710 = shalt.err (!%p1707_p7)
}
  0x21   : > { %s1711_s29 = scalar_lea.vmem %s1997_s23, 6144  ;;  %p1719_p2 = scmp.lt.s32.totalorder %s1997_s23, %s1997_s23 }
  0x22   : > { %p1712_p9 = scmp.ne.s32.totalorder %s1997_s23, %s1711_s29  ;;  %p1720_p6 = scmp.lt.s32.totalorder %s1711_s29, %s1711_s29 }
  0x24   : > { %p1714_p10 = pnand %p1712_p9, %p2020_p13  ;;  %p1721_p12 = por %p1720_p6, %p1719_p2 }
  0x26   : > { %p1715_p1 = pneg %p1714_p10 }
  0x28   : > { %p1722_p0 = pnand %p1721_p12, %p1715_p1 }
  0x2a   : > { %1725 = shalt.err (!%p1722_p0)
}
  0x2b   : > { %s1891_s30 = smov 128   ;;  %s1892_s11 = smov 8  }
  0x2c   : > { %1635 = dma.hbm_to_vmem [thread:$0]  (!%p2004_p11), %s2302_s1, 6144, %s1997_s23, [#allocation6], %s1891_s30, %s1891_s30, %s1892_s11  }
  0x2d   : > { %s1726_s29 = scalar_lea.hbm %s2305_s4, 6144 }
  0x2e   : > { %p1727_p1 = scmp.ne.s32.totalorder %s2305_s4, %s1726_s29  ;;  %p1733_p10 = scmp.lt.u32.totalorder %s1726_s29, %s2305_s4 }
  0x30   : > { %p1729_p2 = pnand %p1727_p1, %p2020_p13 }
  0x32   : > { %p1730_p6 = pneg %p1729_p2 }
  0x34   : > { %p1735_p3 = pnand %p1733_p10, %p1730_p6 }
  0x36   : > { %1738 = shalt.err (!%p1735_p3)
}
  0x37   : > { %s1739_s23 = scalar_lea.vmem %s2008_s26, 6144  ;;  %p1747_p12 = scmp.lt.s32.totalorder %s2008_s26, %s2008_s26 }
  0x38   : > { %p1740_p5 = scmp.ne.s32.totalorder %s2008_s26, %s1739_s23  ;;  %p1748_p0 = scmp.lt.s32.totalorder %s1739_s23, %s1739_s23 }
  0x3a   : > { %p1742_p7 = pnand %p1740_p5, %p2020_p13  ;;  %p1749_p1 = por %p1748_p0, %p1747_p12 }
  0x3c   : > { %p1743_p9 = pneg %p1742_p7 }
  0x3e   : > { %p1750_p2 = pnand %p1749_p1, %p1743_p9 }
  0x40   : > { %1753 = shalt.err (!%p1750_p2)
}
  0x41   : > { %1638 = dma.hbm_to_vmem [thread:$0]  (!%p2004_p11), %s2305_s4, 6144, %s2008_s26, [#allocation6], %s1891_s30, %s1891_s30, %s1892_s11  }
  0x42   : > { %s1754_s12 = scalar_lea.hbm %s2308_s7, 2048 }
  0x43   : > { %p1755_p6 = scmp.ne.s32.totalorder %s2308_s7, %s1754_s12  ;;  %p1761_p5 = scmp.lt.u32.totalorder %s1754_s12, %s2308_s7 }
  0x45   : > { %p1757_p10 = pnand %p1755_p6, %p2020_p13 }
  0x47   : > { %p1758_p3 = pneg %p1757_p10 }
  0x49   : > { %p1763_p7 = pnand %p1761_p5, %p1758_p3 }
  0x4b   : > { %1766 = shalt.err (!%p1763_p7)
}
  0x4c   : > { %s1767_s23 = scalar_lea.vmem %s325_s28, 2048  ;;  %p1775_p1 = scmp.lt.s32.totalorder %s325_s28, %s325_s28 }
  0x4d   : > { %p1768_p9 = scmp.ne.s32.totalorder %s325_s28, %s1767_s23  ;;  %p1776_p2 = scmp.lt.s32.totalorder %s1767_s23, %s1767_s23 }
  0x4f   : > { %p1770_p12 = pnand %p1768_p9, %p2020_p13  ;;  %p1777_p4 = por %p1776_p2, %p1775_p1 }
  0x51   : > { %p1771_p0 = pneg %p1770_p12 }
  0x53   : > { %p1778_p8 = pnand %p1777_p4, %p1771_p0 }
  0x55   : > { %1781 = shalt.err (!%p1778_p8)
}
  0x56   : > { %1641 = dma.hbm_to_vmem [thread:$0]  (!%p2004_p11), %s2308_s7, 2048, %s325_s28, [#allocation9], %s1891_s30, %s1891_s30, %s1892_s11  }
  0x57   : > { %s2093_s22 = sadd.s32 1, %s1886_s16   ;;  %s35_s10 = sadd.s32 1, %s1882_s15 }
  0x58   : > { %s32_s24 = ssub.s32 %s1886_s16, %s2093_s22  ;;  %p42_p8 = scmp.ne.s32.totalorder %s1882_s15, %s1878_s14 }
  0x59   : > { %p33_p4 = scmp.eq.s32.totalorder %s32_s24, 0  ;;  %p43_p13 = scmp.eq.s32.totalorder %s1886_s16, 0 }
  0x5a   : > { %p1653_p6 = scmp.lt.s32.totalorder %s1886_s16, 2  ;;  %p2327_p3 = scmp.eq.s32.totalorder %s1974_s17, 1 }
  0x5b   : > { %s2103_s13 = scalar_select %p33_p4, %s1882_s15, %s35_s10  }
  0x5c   : > { %p44_p10 = por %p43_p13, %p42_p8  ;;  %p2107_p5 = por %p2327_p3, %p42_p8 }
  0x5d   : > { %s344_s12 = sand.u32 1, %s1882_s15   ;;  %s1614_s18 = smul.u32 384, %s1886_s16 }
  0x5e   : > { %s1613_s28 = smul.u32 24, %s344_s12  ;;  %p2113_p11 = pnand %p1653_p6, %p44_p10 }
  0x5f   : > { %s2120_s27 = scalar_lea.hbm %s2301_s0, %s1614_s18  ;;  %s345_s26 = scalar_lea.sflag [#allocation3], %s344_s12 }
  0x60   : > { %s348_s29 = scalar_lea.vmem [#allocation2], %s1613_s28  ;;  %s1782_s6 = scalar_lea.hbm %s2120_s27, 384 }
  0x61   : > { %s356_s23 = sshll.u32 %s348_s29, 4  ;;  %p1783_p7 = scmp.ne.s32.totalorder %s2120_s27, %s1782_s6  ;;  %s2122_s23 = int_to_ptr.vmem [resolvable:$true] %s356_s23 }
  0x62   : > { %p1784_p9 = pneg %p2113_p11  ;;  %s1787_s18 = scalar_lea.hbm %s2301_s0, 768 }
  0x63   : > { %p1788_p1 = scmp.lt.u32.totalorder %s2120_s27, %s2301_s0  ;;  %p1789_p2 = scmp.lt.u32.totalorder %s1787_s18, %s1782_s6 }
  0x64   : > { %p1785_p12 = pnand %p1784_p9, %p1783_p7  ;;  %p1791_p8 = scmp.lt.u32.totalorder %s1782_s6, %s2120_s27 }
  0x65   : > { %p1790_p4 = por %p1789_p2, %p1788_p1 }
  0x66   : > { %p1786_p0 = pneg %p1785_p12 }
  0x67   : > { %p1792_p13 = por %p1791_p8, %p1790_p4 }
  0x69   : > { %p1793_p6 = pnand %p1792_p13, %p1786_p0 }
  0x6b   : > { %1796 = shalt.err (!%p1793_p6)
}
  0x6c   : > { %s1797_s12 = scalar_lea.vmem %s2122_s23, 384  ;;  %s1893_s28 = smov [#allocation2]  }
  0x6d   : > { %p1798_p10 = scmp.ne.s32.totalorder %s2122_s23, %s1797_s12  ;;  %s1802_s29 = sshll.u32 %s1893_s28, 4  ;;  %s1803_s29 = int_to_ptr.vmem [resolvable:$false] %s1802_s29 }
  0x6e   : > { %s1804_s24 = scalar_lea.vmem %s1803_s29, 768  ;;  %p1805_p12 = scmp.lt.s32.totalorder %s2122_s23, %s1803_s29 }
  0x6f   : > { %p1800_p3 = pnand %p1798_p10, %p1784_p9  ;;  %p1806_p1 = scmp.lt.s32.totalorder %s1804_s24, %s1797_s12 }
  0x71   : > { %p1801_p7 = pneg %p1800_p3  ;;  %p1807_p2 = por %p1806_p1, %p1805_p12 }
  0x73   : > { %p1808_p4 = pnand %p1807_p2, %p1801_p7 }
  0x75   : > { %1811 = shalt.err (!%p1808_p4)
}
  0x76   : > { %1645 = dma.hbm_to_vmem [thread:$0]  (!%p2113_p11), %s2120_s27, 384, %s2122_s23, %s345_s26  }
  0x77   : > { %p2330_p0 = scmp.ne.s32.totalorder %s2324_s21, 0 }
  0x78   : > { %s2152_s6 = sand.u32 (!%p2330_p0), 1, %s1878_s14   ;;  %p2331_p9 = scmp.ne.s32.totalorder (!%p2330_p0), %s2321_s19, 0 }
  0x79   : > { %365 = sbr.rel (%p2330_p0) target bundleno = 667 (0x29b), region = 60  ;;  %s368_s18 = scalar_lea.sflag (!%p2330_p0), [#allocation3], %s2152_s6 }
  0x7a   : > { %s1615_s10 = smul.u32 (!%p2330_p0), 24, %s2152_s6 }
  0x7c   : > { %s2156_s11 = scalar_lea.vmem (!%p2330_p0), [#allocation2], %s1615_s10 }
  0x80   : > { %1857 = dma.done.wait (%p2331_p9), %s368_s18, 384  }
  0x81   : > { %1859 = vsyncadd (%p2331_p9), %s368_s18, 4294966912  ;;  %p2332_p11 = scmp.eq.s32.totalorder %s1974_s17, 0 }
  0x83   : > { %1861 = dma.done.wait (%p2332_p11), [#allocation6], 12288   ;;  %p2333_p8 = pmov %p2332_p11 }
  0x85   : > { %1863 = vsyncadd (%p2333_p8), [#allocation6], 4294955008  ;;  %p2334_p13 = pmov %p2333_p8 }
  0x86   : > { %p2335_p6 = pmov %p2333_p8 }
  0x87   : > { %1865 = dma.done.wait (%p2334_p13), [#allocation9], 2048  }
  0x88   : > { %1867 = vsyncadd (%p2335_p6), [#allocation9], 4294965248  ;;  %v1894_v0 = vmov 0.0|0.0   ;;  %vm1895_vm0 = vmmov 0   ;;  %v1896_v1 = vmov 0.0   ;;  %v447_v2 = vld [vmem:[#allocation5 + $0x80] sm:$0xff] }
  0x89   : > { %1493 = vmatprep.subr.bf16.mxu1 %v1894_v0  ;;  %1318 = vmatprep.mubr.msk.f32.mxu1 %vm1895_vm0, %v1896_v1  ;;  %v448_v3 = vld [vmem:[#allocation5 + $0x88] sm:$0xff]  ;;  %v431_v4 = vld [vmem:[#allocation5] sm:$0xff]  ;;  %v449_v11 = vld [vmem:[#allocation5 + $0x90] sm:$0xff]  ;;  %s1153_s24 = sshll.u32 %s2152_s6, 3  ;;  %s1163_s19 = sshll.u32 %s1974_s17, 7 }
  0x8a   : > { %v1461_v5 = vpack.c.bf16 %v448_v3, %v447_v2  ;;  %v432_v6 = vld [vmem:[#allocation5 + $0x8] sm:$0xff]  ;;  %v463_v7 = vld [vmem:[#allocation5 + $0x100] sm:$0xff]  ;;  %v450_v12 = vld [vmem:[#allocation5 + $0x98] sm:$0xff]  ;;  %s419_s21 = scalar_lea.vmem [#allocation10], %s1153_s24  ;;  %s2337_s26 = sld [smem:[#allocation18_spill]] }
  0x8b   : > { %v464_v8 = vld [vmem:[#allocation5 + $0x108] sm:$0xff]  ;;  %v1463_v9 = vpack.c.bf16 %v432_v6, %v431_v4  ;;  %v433_v13 = vld [vmem:[#allocation5 + $0x10] sm:$0xff]  ;;  %v1465_v14 = vpack.c.bf16 %v450_v12, %v449_v11  ;;  %v434_v15 = vld [vmem:[#allocation5 + $0x18] sm:$0xff]  ;;  %s1043_s30 = sshll.u32 %s419_s21, 4  ;;  %s1030_s12 = scalar_lea.sflag [#allocation4], %s2152_s6  ;;  %s2259_s30 = int_to_ptr.vmem [resolvable:$true] %s1043_s30 }
  0x8c   : > { %v1494_v10 = vpack.c.bf16 %v464_v8, %v463_v7  ;;  %1462 = vmatprep.subr.bf16.mxu0 %v1461_v5  ;;  %v465_v16 = vld [vmem:[#allocation5 + $0x110] sm:$0xff]  ;;  %v466_v17 = vld [vmem:[#allocation5 + $0x118] sm:$0xff]  ;;  %v1467_v18 = vpack.c.bf16 %v434_v15, %v433_v13  ;;  %v451_v20 = vld [vmem:[#allocation5 + $0xa0] sm:$0xff]  ;;  %s1812_s28 = scalar_lea.vmem %s2259_s30, 128  ;;  %s1897_s17 = smov [#allocation10]  }
  0x8d   : > { %1464 = vmatpush3.bf16.msra.mxu0 %v1463_v9  ;;  %v1497_v19 = vpack.c.bf16 %v466_v17, %v465_v16  ;;  %v452_v21 = vld [vmem:[#allocation5 + $0xa8] sm:$0xff]  ;;  %v435_v22 = vld [vmem:[#allocation5 + $0x20] sm:$0xff]  ;;  %v453_v27 = vld [vmem:[#allocation5 + $0xb0] sm:$0xff]  ;;  %p1813_p10 = scmp.ne.s32.totalorder %s2259_s30, %s1812_s28  ;;  %s1816_s29 = sshll.u32 %s1897_s17, 4  ;;  %s1817_s29 = int_to_ptr.vmem [resolvable:$false] %s1816_s29 }
  0x8e   : > { %1495 = vmatpush3.bf16.msra.mxu1 %v1494_v10  ;;  %1466 = vmatprep.subr.bf16.mxu0 %v1465_v14  ;;  %v1469_v23 = vpack.c.bf16 %v452_v21, %v451_v20  ;;  %v436_v24 = vld [vmem:[#allocation5 + $0x28] sm:$0xff]  ;;  %v467_v25 = vld [vmem:[#allocation5 + $0x120] sm:$0xff]  ;;  %v454_v28 = vld [vmem:[#allocation5 + $0xb8] sm:$0xff]  ;;  %s1818_s24 = scalar_lea.vmem %s1817_s29, 256  ;;  %p1819_p12 = scmp.lt.s32.totalorder %s2259_s30, %s1817_s29 }
  0x8f   : > { %1496 = vmatprep.subr.bf16.mxu1 %v1894_v0  ;;  %v468_v26 = vld [vmem:[#allocation5 + $0x128] sm:$0xff]  ;;  %v1471_v29 = vpack.c.bf16 %v436_v24, %v435_v22  ;;  %v437_v31 = vld [vmem:[#allocation5 + $0x30] sm:$0xff]  ;;  %v1473_v32 = vpack.c.bf16 %v454_v28, %v453_v27  ;;  %v438_v33 = vld [vmem:[#allocation5 + $0x38] sm:$0xff]  ;;  %p1814_p3 = pnand %p1813_p10, %p2107_p5  ;;  %p1820_p1 = scmp.lt.s32.totalorder %s1818_s24, %s1812_s28 }
  0x90   : > { %v1500_v30 = vpack.c.bf16 %v468_v26, %v467_v25  ;;  %v469_v34 = vld [vmem:[#allocation5 + $0x130] sm:$0xff]  ;;  %v470_v35 = vld [vmem:[#allocation5 + $0x138] sm:$0xff]  ;;  %v455_v36 = vld [vmem:[#allocation5 + $0xc0] sm:$0xff]  ;;  %v1475_v38 = vpack.c.bf16 %v438_v33, %v437_v31  ;;  %s2257_s25 = scalar_lea.hbm %s2337_s26, %s1163_s19 }
  0x91   : > { %1468 = vmatpush3.bf16.msra.mxu0 %v1467_v18  ;;  %v456_v37 = vld [vmem:[#allocation5 + $0xc8] sm:$0xff]  ;;  %v1503_v39 = vpack.c.bf16 %v470_v35, %v469_v34  ;;  %v439_v40 = vld [vmem:[#allocation5 + $0x40] sm:$0xff]  ;;  %v457_v45 = vld [vmem:[#allocation5 + $0xd0] sm:$0xff]  ;;  %p1815_p7 = pneg %p1814_p3  ;;  %p1821_p2 = por %p1820_p1, %p1819_p12 }
  0x92   : > { %1498 = vmatpush3.bf16.msra.mxu1 %v1497_v19  ;;  %1470 = vmatprep.subr.bf16.mxu0 %v1469_v23  ;;  %v1477_v41 = vpack.c.bf16 %v456_v37, %v455_v36  ;;  %v440_v42 = vld [vmem:[#allocation5 + $0x48] sm:$0xff]  ;;  %v471_v43 = vld [vmem:[#allocation5 + $0x140] sm:$0xff]  ;;  %v458_v46 = vld [vmem:[#allocation5 + $0xd8] sm:$0xff] }
  0x93   : > { %1499 = vmatprep.subr.bf16.mxu1 %v1894_v0  ;;  %v472_v44 = vld [vmem:[#allocation5 + $0x148] sm:$0xff]  ;;  %v2177_v47 = vld [vmem:[%s2156_s11 + $0x8] sm:$0xff]  ;;  %v1479_v48 = vpack.c.bf16 %v440_v42, %v439_v40  ;;  %v1481_v51 = vpack.c.bf16 %v458_v46, %v457_v45  ;;  %v459_v55 = vld [vmem:[#allocation5 + $0xe0] sm:$0xff]  ;;  %p1822_p4 = pnand %p1821_p2, %p1815_p7 }
  0x94   : > { %v1506_v49 = vpack.c.bf16 %v472_v44, %v471_v43  ;;  %v441_v50 = vld [vmem:[#allocation5 + $0x50] sm:$0xff]  ;;  %v442_v52 = vld [vmem:[#allocation5 + $0x58] sm:$0xff]  ;;  %v460_v56 = vld [vmem:[#allocation5 + $0xe8] sm:$0xff]  ;;  %543 = vmatprep.mubr.f32.mxu0 %v2177_v47 }
  0x95   : > { %1472 = vmatpush3.bf16.msra.mxu0 %v1471_v29  ;;  %v473_v53 = vld [vmem:[#allocation5 + $0x150] sm:$0xff]  ;;  %v474_v54 = vld [vmem:[#allocation5 + $0x158] sm:$0xff]  ;;  %v1483_v57 = vpack.c.bf16 %v442_v52, %v441_v50  ;;  %v443_v59 = vld [vmem:[#allocation5 + $0x60] sm:$0xff]  ;;  %v1485_v60 = vpack.c.bf16 %v460_v56, %v459_v55 }
  0x96   : > { %1501 = vmatpush3.bf16.msra.mxu1 %v1500_v30  ;;  %1474 = vmatprep.subr.bf16.mxu0 %v1473_v32  ;;  %v1509_v58 = vpack.c.bf16 %v474_v54, %v473_v53  ;;  %v444_v61 = vld [vmem:[#allocation5 + $0x68] sm:$0xff]  ;;  %v475_v62 = vld [vmem:[#allocation5 + $0x160] sm:$0xff]  ;;  %v461_v2 = vld [vmem:[#allocation5 + $0xf0] sm:$0xff] }
  0x97   : > { %1502 = vmatprep.subr.bf16.mxu1 %v1894_v0  ;;  %v476_v63 = vld [vmem:[#allocation5 + $0x168] sm:$0xff]  ;;  %v462_v3 = vld [vmem:[#allocation5 + $0xf8] sm:$0xff]  ;;  %v1487_v4 = vpack.c.bf16 %v444_v61, %v443_v59  ;;  %v445_v6 = vld [vmem:[#allocation5 + $0x70] sm:$0xff] }
  0x98   : > { %v1512_v5 = vpack.c.bf16 %v476_v63, %v475_v62  ;;  %v1489_v7 = vpack.c.bf16 %v462_v3, %v461_v2  ;;  %v446_v8 = vld [vmem:[#allocation5 + $0x78] sm:$0xff]  ;;  %v477_v9 = vld [vmem:[#allocation5 + $0x170] sm:$0xff]  ;;  %v636_v13 = vld [vmem:[#allocation7] sm:$0xff] }
  0x99   : > { %1476 = vmatpush3.bf16.msra.mxu0 %v1475_v38  ;;  %v478_v10 = vld [vmem:[#allocation5 + $0x178] sm:$0xff]  ;;  %v1491_v11 = vpack.c.bf16 %v446_v8, %v445_v6  ;;  %v637_v14 = vld [vmem:[#allocation7 + $0x8] sm:$0xff]  ;;  %v722_v15 = vld [vmem:[#allocation7 + $0x80] sm:$0xff] }
  0x9a   : > { %1504 = vmatpush3.bf16.msra.mxu1 %v1503_v39  ;;  %1478 = vmatprep.subr.bf16.mxu0 %v1477_v41  ;;  %v1515_v12 = vpack.c.bf16 %v478_v10, %v477_v9  ;;  %v723_v16 = vld [vmem:[#allocation7 + $0x88] sm:$0xff]  ;;  %v422_v18 = vld [vmem:[%s2156_s11 + $0x10] sm:$0xff]  ;;  %v1518_v19 = vpack.c.bf16 %v637_v14, %v636_v13  ;;  %v638_v21 = vld [vmem:[#allocation7 + $0x10] sm:$0xff] }
  0x9b   : > { %1505 = vmatprep.subr.bf16.mxu1 %v1894_v0  ;;  %v420_v17 = vld [vmem:[%s2156_s11] sm:$0xff]  ;;  %v1542_v20 = vpack.c.bf16 %v723_v16, %v722_v15  ;;  %v639_v22 = vld [vmem:[#allocation7 + $0x18] sm:$0xff]  ;;  %v640_v27 = vld [vmem:[#allocation7 + $0x20] sm:$0xff]  ;;  %s2336_s11 = sld [smem:[#allocation17_spill]] }
  0x9c   : > { %v724_v23 = vld [vmem:[#allocation7 + $0x90] sm:$0xff]  ;;  %v725_v24 = vld [vmem:[#allocation7 + $0x98] sm:$0xff]  ;;  %v1521_v25 = vpack.c.bf16 %v639_v22, %v638_v21  ;;  %v641_v28 = vld [vmem:[#allocation7 + $0x28] sm:$0xff] }
  0x9d   : > { %1480 = vmatpush3.bf16.msra.mxu0 %v1479_v48  ;;  %v1545_v26 = vpack.c.bf16 %v725_v24, %v724_v23  ;;  %v726_v29 = vld [vmem:[#allocation7 + $0xa0] sm:$0xff]  ;;  %v727_v30 = vld [vmem:[#allocation7 + $0xa8] sm:$0xff]  ;;  %v1524_v31 = vpack.c.bf16 %v641_v28, %v640_v27  ;;  %v642_v33 = vld [vmem:[#allocation7 + $0x30] sm:$0xff] }
  0x9e   : > { %1507 = vmatpush3.bf16.msra.mxu1 %v1506_v49  ;;  %1482 = vmatprep.subr.bf16.mxu0 %v1481_v51  ;;  %v1548_v32 = vpack.c.bf16 %v727_v30, %v726_v29  ;;  %v643_v34 = vld [vmem:[#allocation7 + $0x38] sm:$0xff]  ;;  %v728_v35 = vld [vmem:[#allocation7 + $0xb0] sm:$0xff]  ;;  %v644_v39 = vld [vmem:[#allocation7 + $0x40] sm:$0xff] }
  0x9f   : > { %1508 = vmatprep.subr.bf16.mxu1 %v1894_v0  ;;  %v729_v36 = vld [vmem:[#allocation7 + $0xb8] sm:$0xff]  ;;  %v1527_v37 = vpack.c.bf16 %v643_v34, %v642_v33  ;;  %v645_v40 = vld [vmem:[#allocation7 + $0x48] sm:$0xff]  ;;  %v730_v41 = vld [vmem:[#allocation7 + $0xc0] sm:$0xff] }
  0xa0   : > { %v1551_v38 = vpack.c.bf16 %v729_v36, %v728_v35  ;;  %v731_v42 = vld [vmem:[#allocation7 + $0xc8] sm:$0xff]  ;;  %v1530_v43 = vpack.c.bf16 %v645_v40, %v644_v39  ;;  %v646_v45 = vld [vmem:[#allocation7 + $0x50] sm:$0xff]  ;;  %v647_v46 = vld [vmem:[#allocation7 + $0x58] sm:$0xff] }
  0xa1   : > { %1484 = vmatpush3.bf16.msra.mxu0 %v1483_v57  ;;  %v1554_v44 = vpack.c.bf16 %v731_v42, %v730_v41  ;;  %v1533_v48 = vpack.c.bf16 %v647_v46, %v646_v45  ;;  %v732_v49 = vld [vmem:[#allocation7 + $0xd0] sm:$0xff]  ;;  %v733_v50 = vld [vmem:[#allocation7 + $0xd8] sm:$0xff]  ;;  %v648_v52 = vld [vmem:[#allocation7 + $0x60] sm:$0xff] }
  0xa2   : > { %1510 = vmatpush3.bf16.msra.mxu1 %v1509_v58  ;;  %1486 = vmatprep.subr.bf16.mxu0 %v1485_v60  ;;  %v1557_v51 = vpack.c.bf16 %v733_v50, %v732_v49  ;;  %v649_v53 = vld [vmem:[#allocation7 + $0x68] sm:$0xff]  ;;  %v734_v55 = vld [vmem:[#allocation7 + $0xe0] sm:$0xff]  ;;  %v650_v58 = vld [vmem:[#allocation7 + $0x70] sm:$0xff] }
  0xa3   : > { %1511 = vmatprep.subr.bf16.mxu1 %v1894_v0  ;;  %v1536_v54 = vpack.c.bf16 %v649_v53, %v648_v52  ;;  %v735_v56 = vld [vmem:[#allocation7 + $0xe8] sm:$0xff]  ;;  %v651_v59 = vld [vmem:[#allocation7 + $0x78] sm:$0xff]  ;;  %v736_v61 = vld [vmem:[#allocation7 + $0xf0] sm:$0xff] }
  0xa4   : > { %v1560_v57 = vpack.c.bf16 %v735_v56, %v734_v55  ;;  %v1539_v60 = vpack.c.bf16 %v651_v59, %v650_v58  ;;  %v737_v62 = vld [vmem:[#allocation7 + $0xf8] sm:$0xff]  ;;  %v1157_v9 = vld [vmem:[%s2304_s3] ss:$0 sm:$0xff]  ;;  %v808_v10 = vld [vmem:[#allocation7 + $0x100] sm:$0xff] }
  0xa5   : > { %1488 = vmatpush3.bf16.msra.mxu0 %v1487_v4  ;;  %v1563_v63 = vpack.c.bf16 %v737_v62, %v736_v61  ;;  %v924_v13 = vld [vmem:[#allocation8] sm:$0xff]  ;;  %v925_v14 = vld [vmem:[#allocation8 + $0x8] sm:$0xff]  ;;  %v926_v21 = vld [vmem:[#allocation8 + $0x10] sm:$0xff]  ;;  %v423_v62 = vlaneseq }
  0xa6   : > { %1513 = vmatpush3.bf16.msra.mxu1 %v1512_v5  ;;  %1490 = vmatprep.subr.bf16.mxu0 %v1489_v7  ;;  %v1156_v7 = vld [vmem:[%s2303_s2] ss:$0 sm:$0xff]  ;;  %v927_v22 = vld [vmem:[#allocation8 + $0x18] sm:$0xff]  ;;  %v812_v24 = vld [vmem:[#allocation7 + $0x120] sm:$0xff] }
  0xa7   : > { %1514 = vmatprep.subr.bf16.mxu1 %v1894_v0  ;;  %v928_v27 = vld [vmem:[#allocation8 + $0x20] sm:$0xff]  ;;  %v929_v28 = vld [vmem:[#allocation8 + $0x28] sm:$0xff]  ;;  %v814_v30 = vld [vmem:[#allocation7 + $0x130] sm:$0xff] }
  0xa8   : > { %v930_v33 = vld [vmem:[#allocation8 + $0x30] sm:$0xff]  ;;  %v931_v34 = vld [vmem:[#allocation8 + $0x38] sm:$0xff]  ;;  %v816_v36 = vld [vmem:[#allocation7 + $0x140] sm:$0xff] }
  0xa9   : > { %1492 = vmatpush3.bf16.msra.mxu0 %v1491_v11  ;;  %v932_v39 = vld [vmem:[#allocation8 + $0x40] sm:$0xff]  ;;  %v933_v40 = vld [vmem:[#allocation8 + $0x48] sm:$0xff]  ;;  %v818_v42 = vld [vmem:[#allocation7 + $0x150] sm:$0xff] }
  0xaa   : > { %1516 = vmatpush3.bf16.msra.mxu1 %v1515_v12  ;;  %1517 = vmatprep.subr.bf16.mxu0 %v1894_v0  ;;  %v809_v12 = vld [vmem:[#allocation7 + $0x108] sm:$0xff]  ;;  %v934_v45 = vld [vmem:[#allocation8 + $0x50] sm:$0xff]  ;;  %v935_v46 = vld [vmem:[#allocation8 + $0x58] sm:$0xff] }
  0xab   : > { %1541 = vmatprep.subr.bf16.mxu1 %v1894_v0  ;;  %v1566_v16 = vpack.c.bf16 %v809_v12, %v808_v10  ;;  %v820_v49 = vld [vmem:[#allocation7 + $0x160] sm:$0xff]  ;;  %v1605_v50 = vpack.c.bf16 %v935_v46, %v934_v45  ;;  %v937_v53 = vld [vmem:[#allocation8 + $0x68] sm:$0xff]  ;;  %v822_v55 = vld [vmem:[#allocation7 + $0x170] sm:$0xff] }
  0xac   : > { %544 = vmatmul.mubr.f32.vlgmr.msra.gmra.mrb[0].mxu0 %v420_v17  ;;  %v810_v17 = vld [vmem:[#allocation7 + $0x110] sm:$0xff]  ;;  %v936_v52 = vld [vmem:[#allocation8 + $0x60] sm:$0xff]  ;;  %v939_v59 = vld [vmem:[#allocation8 + $0x78] sm:$0xff] }
  0xad   : > { %1319 = vmatmul.mubr.f32.vlgmr.msra.gmra.mrb[0].mxu1 %v422_v18  ;;  %1519 = vmatpush3.bf16.msra.mxu0 %v1518_v19  ;;  %v1590_v18 = vpack.c.bf16 %v925_v14, %v924_v13  ;;  %v1608_v56 = vpack.c.bf16 %v937_v53, %v936_v52  ;;  %v938_v58 = vld [vmem:[#allocation8 + $0x70] sm:$0xff] }
  0xae   : > { %1543 = vmatpush3.bf16.msra.mxu1 %v1542_v20  ;;  %1520 = vmatprep.subr.bf16.mxu0 %v1894_v0  ;;  %v811_v20 = vld [vmem:[#allocation7 + $0x118] sm:$0xff]  ;;  %v1611_v61 = vpack.c.bf16 %v939_v59, %v938_v58 }
  0xaf   : > { %1544 = vmatprep.subr.bf16.mxu1 %v1894_v0  ;;  %1353 = vmatprep.mubr.msk.f32.mxu0 %vm1895_vm0, %v1896_v1  ;;  %v1569_v23 = vpack.c.bf16 %v811_v20, %v810_v17  ;;  %v1158_v17 = vld [vmem:[%s2306_s5] ss:$0 sm:$0xff] }
  0xb0   : > { %1388 = vmatprep.mubr.msk.f32.mxu1 %vm1895_vm0, %v1896_v1 }
  0xb1   : > { %1522 = vmatpush3.bf16.msra.mxu0 %v1521_v25  ;;  %v1593_v25 = vpack.c.bf16 %v927_v22, %v926_v21 }
  0xb2   : > { %1546 = vmatpush3.bf16.msra.mxu1 %v1545_v26  ;;  %1523 = vmatprep.subr.bf16.mxu0 %v1894_v0  ;;  %v813_v26 = vld [vmem:[#allocation7 + $0x128] sm:$0xff] }
  0xb3   : > { %1547 = vmatprep.subr.bf16.mxu1 %v1894_v0  ;;  %v1572_v29 = vpack.c.bf16 %v813_v26, %v812_v24 }
  0xb5   : > { %1525 = vmatpush3.bf16.msra.mxu0 %v1524_v31  ;;  %v1596_v31 = vpack.c.bf16 %v929_v28, %v928_v27 }
  0xb6   : > { %1549 = vmatpush3.bf16.msra.mxu1 %v1548_v32  ;;  %1526 = vmatprep.subr.bf16.mxu0 %v1894_v0  ;;  %v815_v32 = vld [vmem:[#allocation7 + $0x138] sm:$0xff] }
  0xb7   : > { %1550 = vmatprep.subr.bf16.mxu1 %v1894_v0  ;;  %v1575_v35 = vpack.c.bf16 %v815_v32, %v814_v30 }
  0xb9   : > { %1528 = vmatpush3.bf16.msra.mxu0 %v1527_v37  ;;  %v1599_v37 = vpack.c.bf16 %v931_v34, %v930_v33 }
  0xba   : > { %1552 = vmatpush3.bf16.msra.mxu1 %v1551_v38  ;;  %1529 = vmatprep.subr.bf16.mxu0 %v1894_v0  ;;  %v817_v38 = vld [vmem:[#allocation7 + $0x148] sm:$0xff] }
  0xbb   : > { %1553 = vmatprep.subr.bf16.mxu1 %v1894_v0  ;;  %v1578_v41 = vpack.c.bf16 %v817_v38, %v816_v36 }
  0xbd   : > { %1531 = vmatpush3.bf16.msra.mxu0 %v1530_v43  ;;  %v1602_v43 = vpack.c.bf16 %v933_v40, %v932_v39 }
  0xbe   : > { %1555 = vmatpush3.bf16.msra.mxu1 %v1554_v44  ;;  %1532 = vmatprep.subr.bf16.mxu0 %v1894_v0  ;;  %v819_v44 = vld [vmem:[#allocation7 + $0x158] sm:$0xff] }
  0xbf   : > { %1556 = vmatprep.subr.bf16.mxu1 %v1894_v0 }
  0xc1   : > { %1534 = vmatpush3.bf16.msra.mxu0 %v1533_v48  ;;  %v1581_v48 = vpack.c.bf16 %v819_v44, %v818_v42 }
  0xc2   : > { %1558 = vmatpush3.bf16.msra.mxu1 %v1557_v51  ;;  %1535 = vmatprep.subr.bf16.mxu0 %v1894_v0  ;;  %v821_v51 = vld [vmem:[#allocation7 + $0x168] sm:$0xff] }
  0xc3   : > { %1559 = vmatprep.subr.bf16.mxu1 %v1894_v0 }
  0xc5   : > { %1537 = vmatpush3.bf16.msra.mxu0 %v1536_v54  ;;  %v1584_v54 = vpack.c.bf16 %v821_v51, %v820_v49 }
  0xc6   : > { %1561 = vmatpush3.bf16.msra.mxu1 %v1560_v57  ;;  %1538 = vmatprep.subr.bf16.mxu0 %v1894_v0  ;;  %v823_v57 = vld [vmem:[#allocation7 + $0x178] sm:$0xff] }
  0xc7   : > { %1562 = vmatprep.subr.bf16.mxu1 %v1894_v0 }
  0xc9   : > { %1540 = vmatpush3.bf16.msra.mxu0 %v1539_v60  ;;  %v1587_v60 = vpack.c.bf16 %v823_v57, %v822_v55 }
  0xca   : > { %1564 = vmatpush3.bf16.msra.mxu1 %v1563_v63  ;;  %1565 = vmatprep.subr.bf16.mxu0 %v1894_v0  ;;  %v424_v63 = vshrl.u32 %v423_v62, 7 }
  0xcb   : > { %1589 = vmatprep.subr.bf16.mxu1 %v1894_v0 }
  0xcc   : > { %vm425_vm1 = vcmp.ne.s32.totalorder %v424_v63, 0  ;;  %vm428_vm2 = vcmp.ne.s32.totalorder %v424_v63, 7 }
 0x17f   : > { %v1198_v2 = vpop.f32.mrb[0].mxu0 }
 0x180   : > { %v615_v3 = vpop.f32.mrb[0].mxu1  ;;  %v1199_v4 = vpop.f32.mrb[1].mxu0 }
 0x181   : > { %v1320_v5 = vpop.f32.mrb[1].mxu1  ;;  %v1200_v6 = vadd.f32 %v1199_v4, %v1198_v2 }
 0x183   : > { %v616_v8 = vadd.f32 %v1200_v6, %v615_v3  ;;  %v1154_v3 = vsel %vm425_vm1, 1.0, %v1896_v1 }
 0x185   : > { %v626_v11 = vmul.f32 %v1156_v7, %v616_v8 }
 0x187   : > { %v634_v15 = vadd.f32 %v1157_v9, %v626_v11 }
 0x189   : > { %v2214_v19 = vmax.f32 %v634_v15, 0.0 }
 0x18b   : > { %1354 = vmatmul.mubr.f32.vlgmr.msra.gmra.mrb[2].mxu0 %v2214_v19  ;;  %1389 = vmatmul.mubr.f32.vlgmr.msra.gmra.mrb[2].mxu1 %v2214_v19 }
 0x18c   : > { %1567 = vmatpush3.bf16.msra.mxu0 %v1566_v16  ;;  %1591 = vmatpush3.bf16.msra.mxu1 %v1590_v18 }
 0x18d   : > { %1568 = vmatprep.subr.bf16.mxu0 %v1894_v0  ;;  %1592 = vmatprep.subr.bf16.mxu1 %v1894_v0 }
 0x18e   : > { %1423 = vmatprep.mubr.msk.f32.mxu0 %vm1895_vm0, %v1896_v1  ;;  %1458 = vmatprep.mubr.msk.f32.mxu1 %vm1895_vm0, %v1896_v1 }
 0x190   : > { %1570 = vmatpush3.bf16.msra.mxu0 %v1569_v23  ;;  %1594 = vmatpush3.bf16.msra.mxu1 %v1593_v25 }
 0x191   : > { %1571 = vmatprep.subr.bf16.mxu0 %v1894_v0  ;;  %1595 = vmatprep.subr.bf16.mxu1 %v1894_v0 }
 0x194   : > { %1573 = vmatpush3.bf16.msra.mxu0 %v1572_v29  ;;  %1597 = vmatpush3.bf16.msra.mxu1 %v1596_v31 }
 0x195   : > { %1574 = vmatprep.subr.bf16.mxu0 %v1894_v0  ;;  %1598 = vmatprep.subr.bf16.mxu1 %v1894_v0 }
 0x198   : > { %1576 = vmatpush3.bf16.msra.mxu0 %v1575_v35  ;;  %1600 = vmatpush3.bf16.msra.mxu1 %v1599_v37 }
 0x199   : > { %1577 = vmatprep.subr.bf16.mxu0 %v1894_v0  ;;  %1601 = vmatprep.subr.bf16.mxu1 %v1894_v0 }
 0x19c   : > { %1579 = vmatpush3.bf16.msra.mxu0 %v1578_v41  ;;  %1603 = vmatpush3.bf16.msra.mxu1 %v1602_v43 }
 0x19d   : > { %1580 = vmatprep.subr.bf16.mxu0 %v1894_v0  ;;  %1604 = vmatprep.subr.bf16.mxu1 %v1894_v0 }
 0x1a0   : > { %1582 = vmatpush3.bf16.msra.mxu0 %v1581_v48  ;;  %1606 = vmatpush3.bf16.msra.mxu1 %v1605_v50 }
 0x1a1   : > { %1583 = vmatprep.subr.bf16.mxu0 %v1894_v0  ;;  %1607 = vmatprep.subr.bf16.mxu1 %v1894_v0 }
 0x1a4   : > { %1585 = vmatpush3.bf16.msra.mxu0 %v1584_v54  ;;  %1609 = vmatpush3.bf16.msra.mxu1 %v1608_v56 }
 0x1a5   : > { %1586 = vmatprep.subr.bf16.mxu0 %v1894_v0  ;;  %1610 = vmatprep.subr.bf16.mxu1 %v1894_v0  ;;  %v1155_v0 = vsel %vm428_vm2, 1.0, %v1896_v1  ;;  %v1161_v1 = vld [vmem:[%s2310_s9] ss:$0 sm:$0xff] }
 0x1a8   : > { %1588 = vmatpush3.bf16.msra.mxu0 %v1587_v60  ;;  %1612 = vmatpush3.bf16.msra.mxu1 %v1611_v61 }
 0x1ab   : > { %1424 = vmatmul.mubr.f32.vlgmr.msra.gmra.mrb[4].mxu0 %v2214_v19  ;;  %1459 = vmatmul.mubr.f32.vlgmr.msra.gmra.mrb[4].mxu1 %v2177_v47  ;;  %v1160_v47 = vld [vmem:[%s2309_s8] ss:$0 sm:$0xff] }
 0x1ac   : > { %v1159_v19 = vld [vmem:[%s2336_s11] ss:$0 sm:$0xff] }
 0x25e   : > { %v718_v2 = vpop.f32.mrb[2].mxu0  ;;  %v804_v4 = vpop.f32.mrb[2].mxu1 }
 0x25f   : > { %v895_v5 = vrot.slane %v718_v2, 7  ;;  %v1355_v6 = vpop.f32.mrb[3].mxu0  ;;  %v1390_v7 = vpop.f32.mrb[3].mxu1 }
 0x261   : > { %v899_v8 = vmul.f32 %v1154_v3, %v895_v5 }
 0x263   : > { %v900_v9 = vadd.f32 %v899_v8, %v804_v4 }
 0x27e   : > { %v890_v10 = vpop.f32.mrb[4].mxu0  ;;  %v1006_v11 = vpop.f32.mrb[4].mxu1 }
 0x27f   : > { %v902_v12 = vrot.slane %v890_v10, 1  ;;  %v1425_v13 = vpop.f32.mrb[5].mxu0  ;;  %v1460_v14 = vpop.f32.mrb[5].mxu1  ;;  %v1017_v16 = vmul.f32 %v1160_v47, %v1006_v11 }
 0x281   : > { %v906_v15 = vmul.f32 %v1155_v0, %v902_v12  ;;  %v1025_v21 = vadd.f32 %v1161_v1, %v1017_v16 }
 0x283   : > { %v907_v18 = vadd.f32 %v906_v15, %v900_v9 }
 0x285   : > { %v915_v20 = vmul.f32 %v1158_v17, %v907_v18 }
 0x287   : > { %v923_v22 = vadd.f32 %v1159_v19, %v915_v20 }
 0x289   : > { %v1026_v23 = vadd.f32 %v1025_v21, %v923_v22 }
 0x28b   : > { %v1027_v24 = vmax.f32 %v1026_v23, 0.0 }
 0x28d   : > { %1028 = vst [vmem:[%s419_s21] sm:$0xff] %v1027_v24 }
 0x28e   : > { %1825 = shalt.err (!%p1822_p4)
}
 0x28f   : > { %s1826_s6 = scalar_lea.hbm %s2257_s25, 128  ;;  %s1830_s11 = scalar_lea.hbm %s2337_s26, 256 }
 0x290   : > { %p1827_p0 = scmp.ne.s32.totalorder %s2257_s25, %s1826_s6  ;;  %p1831_p8 = scmp.lt.u32.totalorder %s2257_s25, %s2337_s26 }
 0x291   : > { %p1832_p13 = scmp.lt.u32.totalorder %s1830_s11, %s1826_s6  ;;  %p1834_p10 = scmp.lt.u32.totalorder %s1826_s6, %s2257_s25 }
 0x292   : > { %p1828_p9 = pnand %p1827_p0, %p2107_p5 }
 0x293   : > { %p1833_p6 = por %p1832_p13, %p1831_p8 }
 0x294   : > { %p1829_p11 = pneg %p1828_p9 }
 0x295   : > { %p1835_p3 = por %p1834_p10, %p1833_p6 }
 0x297   : > { %p1836_p7 = pnand %p1835_p3, %p1829_p11 }
 0x299   : > { %1839 = shalt.err (!%p1836_p7)
}
 0x29a   : > { %1630 = dma.vmem_to_hbm [thread:$0]  (%p2107_p5), %s2259_s30, 128, %s2257_s25, %s1030_s12  }
 0x29b PF: > { %s2338_s27 = sld [smem:[#allocation15_spill]]  ;;  %s2339_s23 = sld [smem:[#allocation16_spill]] }
 0x29c   : > { %p2341_p1 = scmp.ge.s32.totalorder %s1886_s16, 2 }
 0x2a1   : > { %s1055_s28 = sand.u32 1, %s2338_s27   ;;  %p2340_p12 = scmp.ne.s32.totalorder %s2339_s23, 0 }
 0x2a2   : > { %s1056_s17 = scalar_lea.sflag [#allocation4], %s1055_s28 }
 0x2a3   : > { %p1647_p2 = pnand %p2341_p1, %p2340_p12 }
 0x2a5   : > { %1869 = dma.done.wait (!%p1647_p2), %s1056_s17, 128  }
 0x2a6   : > { %1871 = vsyncadd (!%p1647_p2), %s1056_s17, 4294967168  ;;  %s2342_s29 = smov %s2103_s13  ;;  %p25_p4 = scmp.ge.s32.totalorder %s2093_s22, 4  }
 0x2a7   : > { %s2343_s13 = smov %s1878_s14  ;;  %s2344_s14 = smov %s1882_s15 }
 0x2a8   : > { %s2345_s15 = smov %s2342_s29  ;;  %s2346_s16 = smov %s2093_s22 }
 0x2a9   :  { %27 = sbr.rel (!%p25_p4) target bundleno = 10 (0xa), region = 117 }
 0x2b0   :  { %1061 = vsyncpa [#allocation3], 1 }
 0x2b1   :  { %1063 = vsyncpa [#allocation3 + $0x1], 1 }
 0x2b2   :  { %1064 = vsyncpa [#allocation6], 1 }
 0x2b3   :  { %1065 = vsyncpa [#allocation9], 1 }
 0x2b4   :  { %1066 = vsyncpa [#allocation4], 1 }
 0x2b5   :  { %1068 = vsyncpa [#allocation4 + $0x1], 1 }

</bundles_post_ra>
